<compile_context>
chip_gen: v7x
topology: tpu7x:2x2x1
jax: 0.10.0
libtpu: 0.0.40
codegen_flags: <defaults>
</compile_context>

<pallas_src>
import functools

import jax
import jax.numpy as jnp
from jax.experimental import pallas as pl
from jax.experimental.pallas import tpu as pltpu

PAIRWISE_EPS = 1e-6   # torch F.pairwise_distance default eps
_LANES = 128


def _contrastive_kernel(x1_ref, x2_ref, lbl_ref, sel_ref, out_ref, *,
                        tile_rows, margin, label_slice):
    """One batch tile per grid step -> one partial loss sum (SMEM scalar)."""
    diff = x1_ref[...] - x2_ref[...] + PAIRWISE_EPS              # (T, row_d)  VPU
    # Segmented row reduction on the (idle) MXU: sel is block-diagonal ones, so
    # sq[t, s] = sum of squares of the s-th original row packed into lane-row t.
    sq = jnp.dot(diff * diff, sel_ref[...],
                 preferred_element_type=jnp.float32)             # (T, seg)

    if label_slice:
        # Label is resident for the whole (padded) batch; slice our tile.
        start = pl.multiple_of(pl.program_id(0) * tile_rows, 8)
        lbl = lbl_ref[pl.ds(start, tile_rows), :]                # (T, seg)
    else:
        lbl = lbl_ref[...]                                       # (T, seg)

    d = jnp.sqrt(sq)
    hinge = jnp.maximum(margin - d, 0.0)
    per_row = (1.0 - lbl) * sq + lbl * (hinge * hinge)           # reuse sq, no d*d
    out_ref[0, 0] = jnp.sum(per_row)


def _pick_tile_rows(n_rows, row_d):
    """Largest batch tile that keeps all pipelined inputs well under VMEM."""
    row_bytes = 4 * ((row_d + _LANES - 1) // _LANES) * _LANES    # lane-padded f32 row
    budget = 8 * 1024 * 1024   # conservative vs v7x's 32 MiB scoped VMEM default
    # 2 feature inputs x 2 pipeline buffers + 2 label buffers (label row <= row_bytes)
    tile = budget // (6 * row_bytes)
    tile = max(8, min(2048, (tile // 8) * 8))
    if n_rows <= tile:
        return n_rows, n_rows            # one full-extent block, no padding needed
    n_pad = ((n_rows + tile - 1) // tile) * tile
    return tile, n_pad


def contrastive_loss(output1, output2, label, *, margin=1.0):
    """output1, output2: (B, D); label: (B,) in {0, 1}. Returns scalar f32."""
    B, D = output1.shape
    x1 = output1.astype(jnp.float32)
    x2 = output2.astype(jnp.float32)
    lbl = label.astype(jnp.float32)

    # Lane-dense repack: (B, D) -> (B*D/128, 128) when D | 128 (free, contiguous).
    if D < _LANES and _LANES % D == 0 and (B * D) % _LANES == 0:
        seg = _LANES // D                # original rows packed per lane-dense row
        rows = B // seg
        row_d = _LANES
        x1 = x1.reshape(rows, row_d)
        x2 = x2.reshape(rows, row_d)
        lbl = lbl.reshape(rows, seg)
    else:
        seg = 1
        rows = B
        row_d = D
        lbl = lbl.reshape(B, 1)

    # Block-diagonal selector: sel[l, s] = 1 iff lane l belongs to packed row s.
    # (For the non-packed fallback this is simply a (D, 1) column of ones.)
    sel = (jnp.arange(row_d)[:, None] // D
           == jnp.arange(seg)[None, :]).astype(jnp.float32)

    tile, rows_pad = _pick_tile_rows(rows, row_d)
    if rows_pad > rows:
        # Pad with x1 = -eps, x2 = 0, label = 0  ->  diff = 0 exactly -> loss 0.
        pad = rows_pad - rows
        x1 = jnp.concatenate(
            [x1, jnp.full((pad, row_d), -PAIRWISE_EPS, jnp.float32)], axis=0)
        x2 = jnp.concatenate([x2, jnp.zeros((pad, row_d), jnp.float32)], axis=0)
        lbl = jnp.concatenate([lbl, jnp.zeros((pad, seg), jnp.float32)], axis=0)

    num_tiles = rows_pad // tile

    # Label residency: keep one VMEM-resident copy across the grid when its
    # lane-padded footprint is small; otherwise stream a (tile, seg) block per
    # step alongside the features.
    label_resident = num_tiles > 1 and rows_pad * _LANES * 4 <= (2 << 20)
    if num_tiles == 1 or label_resident:
        lbl_spec = pl.BlockSpec((rows_pad, seg), lambda i: (0, 0))
    else:
        lbl_spec = pl.BlockSpec((tile, seg), lambda i: (i, 0))

    kernel = functools.partial(
        _contrastive_kernel,
        tile_rows=tile,
        margin=float(margin),
        label_slice=label_resident,      # slice only when resident and grid > 1
    )

    partials = pl.pallas_call(
        kernel,
        out_shape=jax.ShapeDtypeStruct((num_tiles, 1), jnp.float32),
        grid_spec=pltpu.PrefetchScalarGridSpec(
            num_scalar_prefetch=0,
            grid=(num_tiles,),
            in_specs=[
                pl.BlockSpec((tile, row_d), lambda i: (i, 0)),   # features, tiled
                pl.BlockSpec((tile, row_d), lambda i: (i, 0)),
                lbl_spec,                                        # label
                pl.BlockSpec((row_d, seg), lambda i: (0, 0)),    # selector, resident
            ],
            out_specs=pl.BlockSpec((1, 1), lambda i: (i, 0),
                                   memory_space=pltpu.SMEM),
        ),
        compiler_params=pltpu.CompilerParams(
            # Independent per-tile partial sums -> shardable across both v7x
            # TensorCores; neutral on single-TC v5e/v6e.
            dimension_semantics=("parallel",),
        ),
    )(x1, x2, lbl, sel)

    # Padded rows contribute exactly 0, so divide by the true batch size.
    return jnp.sum(partials) / jnp.float32(B)


def contrastive_loss_ref(output1, output2, label, margin=1.0):
    diff = output1 - output2 + PAIRWISE_EPS
    d = jnp.sqrt(jnp.sum(diff * diff, axis=-1))
    return jnp.mean(
        (1.0 - label) * d**2 + label * jnp.maximum(margin - d, 0.0) ** 2)


if __name__ == "__main__":
    key = jax.random.PRNGKey(0)
    k1, k2, k3 = jax.random.split(key, 3)

    B, D = 16, 32
    output1 = jax.random.normal(k1, (B, D), dtype=jnp.float32)
    output2 = jax.random.normal(k2, (B, D), dtype=jnp.float32)
    label = jax.random.bernoulli(k3, 0.5, (B,)).astype(jnp.float32)

    loss = contrastive_loss(output1, output2, label)
    loss = jax.block_until_ready(loss)

    ref = contrastive_loss_ref(output1, output2, label)
    assert jnp.allclose(loss, ref, rtol=1e-4, atol=1e-5), (loss, ref)

    print("KERNEL_OK")
</pallas_src>

<mosaic_0001>
module attributes {stable_mosaic.version = 11 : i64} {
  func.func @_contrastive_kernel(%arg0: i32, %arg1: memref<4x128xf32, #tpu.memory_space<vmem>>, %arg2: memref<4x128xf32, #tpu.memory_space<vmem>>, %arg3: memref<4x4xf32, #tpu.memory_space<vmem>>, %arg4: memref<128x4xf32, #tpu.memory_space<vmem>>, %arg5: memref<1x1xf32, #tpu.memory_space<smem>>) attributes {dimension_semantics = [#tpu.dimension_semantics<parallel>], iteration_bounds = array<i64: 1>, scalar_prefetch = 0 : i64, scratch_operands = 0 : i64, tpu.core_type = #tpu.core_type<tc>, window_params = [{transform_indices = @transform_0, window_bounds = array<i64: 4, 128>}, {transform_indices = @transform_1, window_bounds = array<i64: 4, 128>}, {pipeline_mode = #tpu.pipeline_mode<synchronous>, transform_indices = @transform_2, window_bounds = array<i64: 4, 4>}, {pipeline_mode = #tpu.pipeline_mode<synchronous>, transform_indices = @transform_3, window_bounds = array<i64: 128, 4>}, {transform_indices = @transform_4, window_bounds = array<i64: 1, 1>}]} {
    %c0 = arith.constant 0 : index
    %c0_0 = arith.constant 0 : index
    %0 = vector.load %arg1[%c0, %c0_0] : memref<4x128xf32, #tpu.memory_space<vmem>>, vector<4x128xf32>
    %c0_1 = arith.constant 0 : index
    %c0_2 = arith.constant 0 : index
    %1 = vector.load %arg2[%c0_1, %c0_2] : memref<4x128xf32, #tpu.memory_space<vmem>>, vector<4x128xf32>
    %2 = arith.subf %0, %1 : vector<4x128xf32>
    %cst = arith.constant 9.99999997E-7 : f32
    %3 = vector.broadcast %cst : f32 to vector<4x128xf32>
    %4 = arith.addf %2, %3 : vector<4x128xf32>
    %5 = arith.mulf %4, %4 : vector<4x128xf32>
    %c0_3 = arith.constant 0 : index
    %c0_4 = arith.constant 0 : index
    %6 = vector.load %arg4[%c0_3, %c0_4] : memref<128x4xf32, #tpu.memory_space<vmem>>, vector<128x4xf32>
    %cst_5 = arith.constant dense<0.000000e+00> : vector<4x4xf32>
    %7 = tpu.matmul %5, %6, %cst_5 {dimension_numbers = #tpu.dot_dimension_numbers<[1], [0], [0], [1], [0, 0, 1, 1], [], []>} : vector<4x128xf32>, vector<128x4xf32>, vector<4x4xf32> -> vector<4x4xf32>
    %c0_6 = arith.constant 0 : index
    %c0_7 = arith.constant 0 : index
    %8 = vector.load %arg3[%c0_6, %c0_7] : memref<4x4xf32, #tpu.memory_space<vmem>>, vector<4x4xf32>
    %9 = math.sqrt %7 : vector<4x4xf32>
    %cst_8 = arith.constant 1.000000e+00 : f32
    %10 = vector.broadcast %cst_8 : f32 to vector<4x4xf32>
    %11 = arith.subf %10, %9 : vector<4x4xf32>
    %cst_9 = arith.constant 0.000000e+00 : f32
    %12 = vector.broadcast %cst_9 : f32 to vector<4x4xf32>
    %13 = arith.maximumf %11, %12 : vector<4x4xf32>
    %cst_10 = arith.constant 1.000000e+00 : f32
    %14 = vector.broadcast %cst_10 : f32 to vector<4x4xf32>
    %15 = arith.subf %14, %8 : vector<4x4xf32>
    %16 = arith.mulf %15, %7 : vector<4x4xf32>
    %17 = arith.mulf %13, %13 : vector<4x4xf32>
    %18 = arith.mulf %8, %17 : vector<4x4xf32>
    %19 = arith.addf %16, %18 : vector<4x4xf32>
    %20 = vector.shape_cast %19 : vector<4x4xf32> to vector<1x4x4xf32>
    %cst_11 = arith.constant dense<0.000000e+00> : vector<1xf32>
    %21 = vector.multi_reduction <add>, %20, %cst_11 [1, 2] : vector<1x4x4xf32> to vector<1xf32>
    %22 = vector.shape_cast %21 : vector<1xf32> to vector<1x1x1xf32>
    %23 = vector.extract %22[0, 0, 0] : f32 from vector<1x1x1xf32>
    %c0_12 = arith.constant 0 : index
    %c0_13 = arith.constant 0 : index
    %24 = memref.load %arg5[%c0_12, %c0_13] : memref<1x1xf32, #tpu.memory_space<smem>>
    memref.store %23, %arg5[%c0_12, %c0_13] : memref<1x1xf32, #tpu.memory_space<smem>>
    return
  }
  func.func @transform_0(%arg0: i32) -> (i32, i32) {
    %c0_i32 = arith.constant 0 : i32
    %c0_i32_0 = arith.constant 0 : i32
    return %arg0, %c0_i32 : i32, i32
  }
  func.func @transform_1(%arg0: i32) -> (i32, i32) {
    %c0_i32 = arith.constant 0 : i32
    %c0_i32_0 = arith.constant 0 : i32
    return %arg0, %c0_i32 : i32, i32
  }
  func.func @transform_2(%arg0: i32) -> (i32, i32) {
    %c0_i32 = arith.constant 0 : i32
    %c0_i32_0 = arith.constant 0 : i32
    %c0_i32_1 = arith.constant 0 : i32
    return %c0_i32, %c0_i32_0 : i32, i32
  }
  func.func @transform_3(%arg0: i32) -> (i32, i32) {
    %c0_i32 = arith.constant 0 : i32
    %c0_i32_0 = arith.constant 0 : i32
    %c0_i32_1 = arith.constant 0 : i32
    return %c0_i32, %c0_i32_0 : i32, i32
  }
  func.func @transform_4(%arg0: i32) -> (i32, i32) {
    %c0_i32 = arith.constant 0 : i32
    %c0_i32_0 = arith.constant 0 : i32
    return %arg0, %c0_i32 : i32, i32
  }
}

</mosaic_0001>

<bundles_post_ra>
// kernel: tpu_custom_call.1
= control target key start
LH: loop header
LB: loop body
LE: loop exit
PB: predicated region body
PF: predicated region fallthrough
CT: control target
= control target key end

     0   :  { %v246_v3 = vmov 0.0|0.0   ;;  %vm247_vm0 = vmmov 0   ;;  %v248_v6 = vmov 0.0   ;;  %s344_s0 = inlined_call_operand.vmem [shape: f32[4,128], index: 0, kind: input, shape index: {}]   ;;  %s345_s1 = inlined_call_operand.vmem [shape: f32[4,128], index: 1, kind: input, shape index: {}]   ;;  %s346_s2 = inlined_call_operand.vmem [shape: f32[4,4], index: 2, kind: input, shape index: {}]   ;;  %s347_s3 = inlined_call_operand.vmem [shape: f32[128,4], index: 3, kind: input, shape index: {}]   ;;  %s348_s4 = inlined_call_operand.hbm [shape: f32[1,1], index: 4, kind: output, shape index: {}]  }
   0x1   :  { %v23_v0 = vld [vmem:[%s347_s3] sm:$0xff]  ;;  %v24_v1 = vld [vmem:[%s347_s3 + $0x8] sm:$0xff]  ;;  %v25_v2 = vld [vmem:[%s347_s3 + $0x10] sm:$0xff]  ;;  %202 = vmatprep.subr.bf16.mxu0 %v246_v3  ;;  %199 = vmatprep.mubr.msk.f32.mxu0 %vm247_vm0, %v248_v6 }
   0x2   :  { %v203_v4 = vpack.c.bf16 %v24_v1, %v23_v0  ;;  %v26_v5 = vld [vmem:[%s347_s3 + $0x18] sm:$0xff]  ;;  %v27_v8 = vld [vmem:[%s347_s3 + $0x20] sm:$0xff]  ;;  %v28_v9 = vld [vmem:[%s347_s3 + $0x28] sm:$0xff] }
   0x3   :  { %v206_v7 = vpack.c.bf16 %v26_v5, %v25_v2 }
   0x4   :  { %204 = vmatpush3.bf16.msra.mxu0 %v203_v4 }
   0x5   :  { %205 = vmatprep.subr.bf16.mxu0 %v246_v3 }
   0x6   :  { %9 = vsyncpa [#allocation3], 0  ;;  %v209_v10 = vpack.c.bf16 %v28_v9, %v27_v8  ;;  %v29_v11 = vld [vmem:[%s347_s3 + $0x30] sm:$0xff]  ;;  %v30_v12 = vld [vmem:[%s347_s3 + $0x38] sm:$0xff]  ;;  %vm124_vm3 = vcmask 27648   ;;  %s234_s26 = scalar_lea.hbm %s348_s4, 16 }
   0x7   :  { %v212_v13 = vpack.c.bf16 %v30_v12, %v29_v11  ;;  %v31_v14 = vld [vmem:[%s347_s3 + $0x40] sm:$0xff]  ;;  %v32_v15 = vld [vmem:[%s347_s3 + $0x48] sm:$0xff]  ;;  %v33_v17 = vld [vmem:[%s347_s3 + $0x50] sm:$0xff]  ;;  %p235_p0 = scmp.ne.s32.totalorder %s348_s4, %s234_s26  ;;  %p238_p1 = scmp.lt.u32.totalorder %s234_s26, %s348_s4 }
   0x8   :  { %207 = vmatpush3.bf16.msra.mxu0 %v206_v7  ;;  %v215_v16 = vpack.c.bf16 %v32_v15, %v31_v14  ;;  %v34_v18 = vld [vmem:[%s347_s3 + $0x58] sm:$0xff]  ;;  %v18_v20 = vld [vmem:[%s344_s0] sm:$0xf]  ;;  %v36_v23 = vld [vmem:[%s347_s3 + $0x68] sm:$0xff] }
   0x9   :  { %208 = vmatprep.subr.bf16.mxu0 %v246_v3  ;;  %v218_v19 = vpack.c.bf16 %v34_v18, %v33_v17  ;;  %v19_v21 = vld [vmem:[%s345_s1] sm:$0xf]  ;;  %v37_v26 = vld [vmem:[%s347_s3 + $0x70] sm:$0xff]  ;;  %v38_v27 = vld [vmem:[%s347_s3 + $0x78] sm:$0xff]  ;;  %p240_p2 = pnand %p238_p1, %p235_p0 }
   0xa   :  { %v35_v22 = vld [vmem:[%s347_s3 + $0x60] sm:$0xff]  ;;  %v20_v24 = vsub.f32 %v18_v20, %v19_v21  ;;  %v224_v29 = vpack.c.bf16 %v38_v27, %v37_v26 }
   0xb   :  { %v221_v25 = vpack.c.bf16 %v36_v23, %v35_v22  ;;  %v109_v37 = vld [vmem:[%s346_s2] sm:$0xf] }
   0xc   :  { %210 = vmatpush3.bf16.msra.mxu0 %v209_v10  ;;  %v21_v28 = vadd.f32 1e-06, %v20_v24  ;;  %v119_v41 = vsub.f32 1.0, %v109_v37 }
   0xd   :  { %211 = vmatprep.subr.bf16.mxu0 %v246_v3 }
   0xe   :  { %v22_v30 = vmul.f32 %v21_v28, %v21_v28 }
  0x10   :  { %213 = vmatpush3.bf16.msra.mxu0 %v212_v13 }
  0x11   :  { %214 = vmatprep.subr.bf16.mxu0 %v246_v3 }
  0x14   :  { %216 = vmatpush3.bf16.msra.mxu0 %v215_v16 }
  0x15   :  { %217 = vmatprep.subr.bf16.mxu0 %v246_v3 }
  0x18   :  { %219 = vmatpush3.bf16.msra.mxu0 %v218_v19 }
  0x19   :  { %220 = vmatprep.subr.bf16.mxu0 %v246_v3 }
  0x1c   :  { %222 = vmatpush3.bf16.msra.mxu0 %v221_v25 }
  0x1d   :  { %223 = vmatprep.subr.bf16.mxu0 %v246_v3 }
  0x20   :  { %225 = vmatpush3.bf16.msra.mxu0 %v224_v29 }
  0x23   :  { %200 = vmatmul.mubr.f32.vlgmr.msra.gmra.mrb[0].mxu0 %v22_v30 }
  0xf6   :  { %v105_v31 = vpop.f32.mrb[0].mxu0 }
  0xf7   :  { %232 = vrsqrt.f32 %v105_v31  ;;  %v201_v32 = vpop.f32.mrb[1].mxu0  ;;  %vm112_vm1 = vcmp.eq.f32.partialorder %v105_v31, inf  ;;  %v115_v35 = vand.u32 2147483648, %v105_v31  ;;  %vm114_vm2 = vcmp.eq.f32.partialorder %v105_v31, 0.0 }
  0xf8   :  { %v120_v43 = vmul.f32 %v119_v41, %v105_v31 }
 0x101   :  { %v233_v33 = vpop.eup %232 }
 0x102   :  { %v111_v34 = vmul.f32 %v233_v33, %v105_v31 }
 0x104   :  { %v113_v36 = vsel %vm112_vm1, %v105_v31, %v111_v34 }
 0x105   :  { %v116_v38 = vsel %vm114_vm2, %v115_v35, %v113_v36 }
 0x106   :  { %v117_v39 = vsub.f32 1.0, %v116_v38 }
 0x108   :  { %v118_v40 = vmax.f32 %v117_v39, 0.0 }
 0x10a   :  { %v121_v42 = vmul.f32 %v118_v40, %v118_v40 }
 0x10c   :  { %v122_v44 = vmul.f32 %v121_v42, %v109_v37 }
 0x10e   :  { %v123_v45 = vadd.f32 %v122_v44, %v120_v43 }
 0x110   :  { %v125_v46 = vsel %vm124_vm3, %v123_v45, 0.0 }
 0x111   :  { %126 = vadd.xlane.f32.xlu0 %v125_v46 }
 0x19e   :  { %v127_v47 = vpop.xlane.xlu0 %126 }
 0x19f   :  { %v128_v48 = vrot.slane %v127_v47, 4 }
 0x1a1   :  { %v129_v49 = vadd.f32 %v128_v48, %v127_v47 }
 0x1a3   :  { %v130_v50 = vrot.slane %v129_v49, 2 }
 0x1a5   :  { %v131_v51 = vadd.f32 %v130_v50, %v129_v49 }
 0x1a7   :  { %v132_v52 = vrot.slane %v131_v51, 1 }
 0x1a9   :  { %v133_v53 = vadd.f32 %v132_v52, %v131_v51 }
 0x1ab   :  { %226 = vpush %v133_v53 }
 0x1dc   :  { %s227_s2 = spop %226 }
 0x1dd   :  { %136 = sst [smem:[#allocation2]] %s227_s2 }
 0x1de   :  { %243 = shalt.err (!%p240_p2)
}
 0x1df   :  { %s249_s5 = smov [#allocation2]  }
 0x1e0   :  { %144 = dma.smem_to_hbm %s249_s5, 16, %s348_s4, [#allocation3]  }
 0x1e1   :  { %244 = dma.done.wait [#allocation3], 16  }
 0x1e2   :  { %245 = vsyncadd [#allocation3], 4294967280 }
 0x1e3   :  { %148 = sfence }
 0x1e4   :  { %149 = vsyncpa [#allocation3], 1 }

</bundles_post_ra>
